<compile_context>
chip_gen: v7x
topology: tpu7x:2x2x1
jax: 0.10.0
libtpu: 0.0.40
codegen_flags: <defaults>
</compile_context>

<pallas_src>
import functools

import jax
import jax.numpy as jnp
from jax import lax
from jax.experimental import pallas as pl
from jax.experimental.pallas import tpu as pltpu

EPS = 1e-5  # nn.InstanceNorm2d default eps, affine=False, biased variance


def _round_up(v, m):
    return -(-v // m) * m


def bottleneck_kernel(x_ref, w1t_ref, w2u_ref, w2m_ref, w2d_ref, w3t_ref, b3_ref,
                      red_ref, bct_ref, o_ref, *, H, W, nb):
    """One grid step processes `nb` images laid out as (channels, nb*H*W)."""
    HW = H * W
    L = x_ref.shape[1]                       # nb * HW lanes
    x = x_ref[...]                           # (Cin, L)
    inv_hw = 1.0 / HW

    if nb == 1:
        # Single image per step: plain lane reduction / lane broadcast.
        def inorm_relu(v):                   # two-pass IN over the spatial (lane) axis
            m = jnp.sum(v, axis=-1, keepdims=True) * inv_hw
            vc = v - m
            var = jnp.sum(vc * vc, axis=-1, keepdims=True) * inv_hw
            return jnp.maximum(vc * lax.rsqrt(var + EPS), 0.0)
    else:
        # Multiple images per step: per-image reduce/broadcast via MXU segment matmuls
        # (keeps everything 2-D lane-dense; no sublane<->lane relayouts).
        red = red_ref[...]                   # (L, nb)  one-hot lane -> image reducer
        bct = bct_ref[...]                   # (nb, L)  image -> lane broadcaster

        def inorm_relu(v):                   # two-pass IN, per (channel, image)
            m = jnp.dot(v, red, preferred_element_type=jnp.float32) * inv_hw       # (C, nb)
            vc = v - jnp.dot(m, bct, preferred_element_type=jnp.float32)           # (C, L)
            var = jnp.dot(vc * vc, red, preferred_element_type=jnp.float32) * inv_hw
            s = lax.rsqrt(var + EPS)                                                # (C, nb)
            return jnp.maximum(vc * jnp.dot(s, bct, preferred_element_type=jnp.float32), 0.0)

    # --- IN(inplanes) -> ReLU -> 1x1 conv (inplanes -> planes) ---
    h = jnp.dot(w1t_ref[...], inorm_relu(x), preferred_element_type=jnp.float32)    # (P, L)

    # --- IN(planes) -> ReLU ---
    h = inorm_relu(h)                                                                # (P, L)
    P = h.shape[0]
    GP = w2u_ref.shape[1] // 3               # sublane-padded tap group (multiple of 8)

    # --- ReflectionPad2d(1) + 3x3 conv: lane rolls + three (P, 3*GP) matmuls ---
    lane = lax.broadcasted_iota(jnp.int32, (1, L), 1)
    if (W & (W - 1)) == 0 and (H & (H - 1)) == 0:
        col = lane & (W - 1)
        row = (lane >> (W.bit_length() - 1)) & (H - 1)
    else:
        col = lane % W
        row = (lane // W) % H
    c_first, c_last = col == 0, col == W - 1
    r_first, r_last = row == 0, row == H - 1

    def sh(v, k):                            # value at lane (i + k), circular over L;
        return pltpu.roll(v, (-k) % L, axis=1)   # cross-image wraps are masked out below

    hL = jnp.where(c_first, sh(h, 1), sh(h, -1))     # column refl(c-1)
    hR = jnp.where(c_last, sh(h, -1), sh(h, 1))      # column refl(c+1)

    if GP > P:
        z = jnp.zeros((GP - P, L), jnp.float32)
        # (3*GP, L): real tap groups land at 8-row-aligned offsets 0, GP, 2*GP.
        t_mid = jnp.concatenate([hL, z, h, z, hR, z], axis=0)
    else:
        t_mid = jnp.concatenate([hL, h, hR], axis=0)
    t_up = jnp.where(r_first, sh(t_mid, W), sh(t_mid, -W))   # row refl(r-1) of all 3 column taps
    t_dn = jnp.where(r_last, sh(t_mid, -W), sh(t_mid, W))    # row refl(r+1) of all 3 column taps

    h = (jnp.dot(w2u_ref[...], t_up, preferred_element_type=jnp.float32)
         + jnp.dot(w2m_ref[...], t_mid, preferred_element_type=jnp.float32)
         + jnp.dot(w2d_ref[...], t_dn, preferred_element_type=jnp.float32))          # (P, L)

    # --- IN(planes) -> ReLU -> 1x1 conv (planes -> planes*expansion) + bias ---
    h = jnp.dot(w3t_ref[...], inorm_relu(h), preferred_element_type=jnp.float32)     # (Cout, L)

    # identity residual (inplanes == planes*expansion, stride=1, no up/downsample)
    if nb == 1:
        o_ref[...] = x + h + b3_ref[...]                       # (Cout, 1) lane-broadcast
    else:
        bias = jnp.dot(b3_ref[...], bct, preferred_element_type=jnp.float32)          # (Cout, L)
        o_ref[...] = x + h + bias


def _num_parallel_splits():
    # Dual-TensorCore chips (v7x / megacore) want >=2 "parallel" grid steps so the
    # batch is sharded across cores; single-TC chips (v5e/v6e) prefer one big block.
    try:
        kind = jax.devices()[0].device_kind.lower()
    except Exception:
        return 2
    if "lite" in kind or "v5e" in kind or "v6e" in kind:
        return 1
    return 2


def _pick_images_per_block(n, cin, cout, p, gp, hw, splits):
    nb = max(1, -(-n // splits))
    budget = 16 * 1024 * 1024                     # f32 block-data budget (limit below is 2x)

    def est(k):
        l = k * hw
        blocks = 2 * (cin + cout) * l             # double-buffered in/out tiles
        temps = (2 * cin + 3 * p + 9 * gp + 2 * cout) * l   # in-kernel live temporaries
        segs = 2 * (2 * k * l)                    # reduce/broadcast segment matrices
        return 4 * (blocks + temps + segs)

    while nb > 1 and est(nb) > budget:
        nb -= 1
    return nb


def bottleneck_forward(x_nchw, params):
    w1, b1, w2, b2, w3, b3 = params
    # b1/b2 are dead: each is immediately followed by an affine=False InstanceNorm,
    # which subtracts the per-channel spatial mean, so the constant shifts cancel
    # exactly.  (If the norm ever becomes affine / BatchNorm this fusion must change.)
    del b1, b2

    N, Cin, H, W = x_nchw.shape
    P = w1.shape[1]
    Cout = w3.shape[1]
    HW = H * W
    assert Cin == Cout, "identity residual requires inplanes == planes*expansion"
    assert H >= 2 and W >= 2, "reflection padding requires H, W >= 2"
    assert w2.shape[2] == P and w2.shape[3] == P
    GP = _round_up(P, 8)                          # 8-sublane-aligned tap group size

    splits = _num_parallel_splits()
    Nb = _pick_images_per_block(N, Cin, Cout, P, GP, HW, splits)
    N_pad = _round_up(N, Nb)
    L_blk = Nb * HW

    # ---- wrapper-side layout plumbing (one HBM transpose; XLA handles it) ----
    xf = x_nchw.astype(jnp.float32).reshape(N, Cin, HW)
    if N_pad != N:
        xf = jnp.concatenate([xf, jnp.zeros((N_pad - N, Cin, HW), jnp.float32)], axis=0)
    x2d = jnp.transpose(xf, (1, 0, 2)).reshape(Cin, N_pad * HW)      # (Cin, N_pad*HW), lane-dense

    w1t = jnp.transpose(w1, (1, 0)).astype(jnp.float32)              # (P, Cin)
    # (3,3,I,O) HWIO -> three (O, 3*GP) matrices (one per kernel row); each dw tap
    # group is zero-padded to GP columns to match the 8-aligned tap stack layout.
    w2t = jnp.transpose(w2, (0, 3, 1, 2)).astype(jnp.float32)        # (dh, O, dw, I)
    w2t = jnp.pad(w2t, ((0, 0), (0, 0), (0, 0), (0, GP - P)))        # (dh, O, dw, GP)
    w2t = w2t.reshape(3, P, 3 * GP)
    w2u, w2m, w2d = w2t[0], w2t[1], w2t[2]
    w3t = jnp.transpose(w3, (1, 0)).astype(jnp.float32)              # (Cout, P)
    b3r = jnp.tile(b3.astype(jnp.float32).reshape(Cout, 1), (1, Nb))  # (Cout, Nb)

    # Segment matrices for per-image InstanceNorm reduce/broadcast on the MXU.
    seg = jnp.arange(L_blk, dtype=jnp.int32) // HW
    bct = (seg[None, :] == jnp.arange(Nb, dtype=jnp.int32)[:, None]).astype(jnp.float32)  # (Nb, L)
    red = jnp.transpose(bct, (1, 0))                                  # (L, Nb)

    cost = pl.CostEstimate(
        flops=int(2 * N_pad * HW * (Cin * P + 3 * P * 3 * GP + P * Cout)
                  + 8 * N_pad * HW * (Cin + 2 * P)),
        transcendentals=int(N_pad * (Cin + 2 * P)),     # one rsqrt per (instance, channel)
        bytes_accessed=int(4 * (2 * x2d.size + w1t.size + 3 * w2u.size + w3t.size
                                + b3r.size + 2 * red.size)),
    )

    out2d = pl.pallas_call(
        functools.partial(bottleneck_kernel, H=H, W=W, nb=Nb),
        out_shape=jax.ShapeDtypeStruct((Cout, N_pad * HW), jnp.float32),
        grid_spec=pltpu.PrefetchScalarGridSpec(
            num_scalar_prefetch=0,
            grid=(N_pad // Nb,),                        # batch blocks; parallel across TCs
            in_specs=[
                pl.BlockSpec((Cin, L_blk), lambda b: (0, b)),
                pl.BlockSpec((P, Cin), lambda b: (0, 0)),
                pl.BlockSpec((P, 3 * GP), lambda b: (0, 0)),
                pl.BlockSpec((P, 3 * GP), lambda b: (0, 0)),
                pl.BlockSpec((P, 3 * GP), lambda b: (0, 0)),
                pl.BlockSpec((Cout, P), lambda b: (0, 0)),
                pl.BlockSpec((Cout, Nb), lambda b: (0, 0)),
                pl.BlockSpec((L_blk, Nb), lambda b: (0, 0)),
                pl.BlockSpec((Nb, L_blk), lambda b: (0, 0)),
            ],
            out_specs=pl.BlockSpec((Cout, L_blk), lambda b: (0, b)),
        ),
        compiler_params=pltpu.CompilerParams(
            dimension_semantics=("parallel",),
            vmem_limit_bytes=32 * 1024 * 1024,
        ),
        cost_estimate=cost,
    )(x2d, w1t, w2u, w2m, w2d, w3t, b3r, red, bct)

    out = out2d.reshape(Cout, N_pad, HW).transpose(1, 0, 2)[:N]
    return out.reshape(N, Cout, H, W)


def bottleneck_reference(x_nchw, params):
    # Pure-JAX reference (NCHW), mirrors the PyTorch module semantics (keeps b1/b2).
    w1, b1, w2, b2, w3, b3 = params

    def inorm(x):
        mean = jnp.mean(x, axis=(2, 3), keepdims=True)
        var = jnp.mean((x - mean) ** 2, axis=(2, 3), keepdims=True)
        return (x - mean) / jnp.sqrt(var + EPS)

    def conv1x1(x, w, b):
        return jnp.einsum('nchw,cd->ndhw', x, w,
                          precision=lax.Precision.HIGHEST) + b[None, :, None, None]

    h = jnp.maximum(inorm(x_nchw), 0.0)
    h = conv1x1(h, w1, b1)
    h = jnp.maximum(inorm(h), 0.0)
    hp = jnp.pad(h, ((0, 0), (0, 0), (1, 1), (1, 1)), mode='reflect')
    y = lax.conv_general_dilated(hp, w2, window_strides=(1, 1), padding='VALID',
                                 dimension_numbers=('NCHW', 'HWIO', 'NCHW'),
                                 precision=lax.Precision.HIGHEST)
    h = y + b2[None, :, None, None]
    h = jnp.maximum(inorm(h), 0.0)
    h = conv1x1(h, w3, b3)
    return x_nchw + h


if __name__ == "__main__":
    # Shapes implied by the module: planes=4, expansion=4 -> inplanes=16 (identity residual).
    N, planes, expansion, H, W = 2, 4, 4, 16, 16
    inplanes = planes * expansion  # 16

    key = jax.random.PRNGKey(0)
    kx, k1, k2, k3, k4, k5, k6 = jax.random.split(key, 7)

    x = jax.random.normal(kx, (N, inplanes, H, W), dtype=jnp.float32)

    # Deterministic synthetic parameters (nn.Conv2d weights + biases).
    w1 = 0.2 * jax.random.normal(k1, (inplanes, planes), dtype=jnp.float32)            # 1x1
    b1 = 0.1 * jax.random.normal(k2, (planes,), dtype=jnp.float32)
    w2 = 0.2 * jax.random.normal(k3, (3, 3, planes, planes), dtype=jnp.float32)        # 3x3 (HWIO)
    b2 = 0.1 * jax.random.normal(k4, (planes,), dtype=jnp.float32)
    w3 = 0.2 * jax.random.normal(k5, (planes, planes * expansion), dtype=jnp.float32)  # 1x1
    b3 = 0.1 * jax.random.normal(k6, (planes * expansion,), dtype=jnp.float32)
    params = (w1, b1, w2, b2, w3, b3)

    out = jax.block_until_ready(bottleneck_forward(x, params))
    ref = jax.block_until_ready(bottleneck_reference(x, params))

    assert out.shape == (N, inplanes, H, W), out.shape
    err = float(jnp.max(jnp.abs(out - ref)))
    assert err < 1e-3, err
    print("KERNEL_OK")
</pallas_src>

<mosaic_0001>
module attributes {stable_mosaic.version = 11 : i64} {
  func.func @bottleneck_kernel(%arg0: i32, %arg1: memref<16x256xf32, #tpu.memory_space<vmem>>, %arg2: memref<4x16xf32, #tpu.memory_space<vmem>>, %arg3: memref<4x24xf32, #tpu.memory_space<vmem>>, %arg4: memref<4x24xf32, #tpu.memory_space<vmem>>, %arg5: memref<4x24xf32, #tpu.memory_space<vmem>>, %arg6: memref<16x4xf32, #tpu.memory_space<vmem>>, %arg7: memref<16x1xf32, #tpu.memory_space<vmem>>, %arg8: memref<256x1xf32, #tpu.memory_space<vmem>>, %arg9: memref<1x256xf32, #tpu.memory_space<vmem>>, %arg10: memref<16x256xf32, #tpu.memory_space<vmem>>) attributes {dimension_semantics = [#tpu.dimension_semantics<parallel>], iteration_bounds = array<i64: 2>, scalar_prefetch = 0 : i64, scratch_operands = 0 : i64, tpu.core_type = #tpu.core_type<tc>, window_params = [{transform_indices = @transform_0, window_bounds = array<i64: 16, 256>}, {pipeline_mode = #tpu.pipeline_mode<synchronous>, transform_indices = @transform_1, window_bounds = array<i64: 4, 16>}, {pipeline_mode = #tpu.pipeline_mode<synchronous>, transform_indices = @transform_2, window_bounds = array<i64: 4, 24>}, {pipeline_mode = #tpu.pipeline_mode<synchronous>, transform_indices = @transform_3, window_bounds = array<i64: 4, 24>}, {pipeline_mode = #tpu.pipeline_mode<synchronous>, transform_indices = @transform_4, window_bounds = array<i64: 4, 24>}, {pipeline_mode = #tpu.pipeline_mode<synchronous>, transform_indices = @transform_5, window_bounds = array<i64: 16, 4>}, {pipeline_mode = #tpu.pipeline_mode<synchronous>, transform_indices = @transform_6, window_bounds = array<i64: 16, 1>}, {pipeline_mode = #tpu.pipeline_mode<synchronous>, transform_indices = @transform_7, window_bounds = array<i64: 256, 1>}, {pipeline_mode = #tpu.pipeline_mode<synchronous>, transform_indices = @transform_8, window_bounds = array<i64: 1, 256>}, {transform_indices = @transform_9, window_bounds = array<i64: 16, 256>}]} {
    %c0 = arith.constant 0 : index
    %c0_0 = arith.constant 0 : index
    %0 = vector.load %arg1[%c0, %c0_0] : memref<16x256xf32, #tpu.memory_space<vmem>>, vector<16x256xf32>
    %c0_1 = arith.constant 0 : index
    %c0_2 = arith.constant 0 : index
    %1 = vector.load %arg2[%c0_1, %c0_2] : memref<4x16xf32, #tpu.memory_space<vmem>>, vector<4x16xf32>
    %cst = arith.constant dense<0.000000e+00> : vector<16xf32>
    %2 = vector.multi_reduction <add>, %0, %cst [1] : vector<16x256xf32> to vector<16xf32>
    %3 = vector.shape_cast %2 : vector<16xf32> to vector<16x1xf32>
    %cst_3 = arith.constant 3.906250e-03 : f32
    %4 = vector.broadcast %cst_3 : f32 to vector<16x1xf32>
    %5 = arith.mulf %3, %4 : vector<16x1xf32>
    %6 = vector.broadcast %5 : vector<16x1xf32> to vector<16x256xf32>
    %7 = arith.subf %0, %6 : vector<16x256xf32>
    %8 = arith.mulf %7, %7 : vector<16x256xf32>
    %cst_4 = arith.constant dense<0.000000e+00> : vector<16xf32>
    %9 = vector.multi_reduction <add>, %8, %cst_4 [1] : vector<16x256xf32> to vector<16xf32>
    %10 = vector.shape_cast %9 : vector<16xf32> to vector<16x1xf32>
    %cst_5 = arith.constant 3.906250e-03 : f32
    %11 = vector.broadcast %cst_5 : f32 to vector<16x1xf32>
    %12 = arith.mulf %10, %11 : vector<16x1xf32>
    %cst_6 = arith.constant 9.99999974E-6 : f32
    %13 = vector.broadcast %cst_6 : f32 to vector<16x1xf32>
    %14 = arith.addf %12, %13 : vector<16x1xf32>
    %15 = math.rsqrt %14 : vector<16x1xf32>
    %16 = vector.broadcast %15 : vector<16x1xf32> to vector<16x256xf32>
    %17 = arith.mulf %7, %16 : vector<16x256xf32>
    %cst_7 = arith.constant 0.000000e+00 : f32
    %18 = vector.broadcast %cst_7 : f32 to vector<16x256xf32>
    %19 = arith.maximumf %17, %18 : vector<16x256xf32>
    %cst_8 = arith.constant dense<0.000000e+00> : vector<4x256xf32>
    %20 = tpu.matmul %1, %19, %cst_8 {dimension_numbers = #tpu.dot_dimension_numbers<[1], [0], [0], [1], [0, 0, 1, 1], [], []>} : vector<4x16xf32>, vector<16x256xf32>, vector<4x256xf32> -> vector<4x256xf32>
    %cst_9 = arith.constant dense<0.000000e+00> : vector<4xf32>
    %21 = vector.multi_reduction <add>, %20, %cst_9 [1] : vector<4x256xf32> to vector<4xf32>
    %22 = vector.shape_cast %21 : vector<4xf32> to vector<4x1xf32>
    %cst_10 = arith.constant 3.906250e-03 : f32
    %23 = vector.broadcast %cst_10 : f32 to vector<4x1xf32>
    %24 = arith.mulf %22, %23 : vector<4x1xf32>
    %25 = vector.broadcast %24 : vector<4x1xf32> to vector<4x256xf32>
    %26 = arith.subf %20, %25 : vector<4x256xf32>
    %27 = arith.mulf %26, %26 : vector<4x256xf32>
    %cst_11 = arith.constant dense<0.000000e+00> : vector<4xf32>
    %28 = vector.multi_reduction <add>, %27, %cst_11 [1] : vector<4x256xf32> to vector<4xf32>
    %29 = vector.shape_cast %28 : vector<4xf32> to vector<4x1xf32>
    %cst_12 = arith.constant 3.906250e-03 : f32
    %30 = vector.broadcast %cst_12 : f32 to vector<4x1xf32>
    %31 = arith.mulf %29, %30 : vector<4x1xf32>
    %cst_13 = arith.constant 9.99999974E-6 : f32
    %32 = vector.broadcast %cst_13 : f32 to vector<4x1xf32>
    %33 = arith.addf %31, %32 : vector<4x1xf32>
    %34 = math.rsqrt %33 : vector<4x1xf32>
    %35 = vector.broadcast %34 : vector<4x1xf32> to vector<4x256xf32>
    %36 = arith.mulf %26, %35 : vector<4x256xf32>
    %cst_14 = arith.constant 0.000000e+00 : f32
    %37 = vector.broadcast %cst_14 : f32 to vector<4x256xf32>
    %38 = arith.maximumf %36, %37 : vector<4x256xf32>
    %39 = tpu.iota {dimensions = array<i32: 1>} : vector<1x256xi32>
    %c15_i32 = arith.constant 15 : i32
    %40 = vector.broadcast %c15_i32 : i32 to vector<1x256xi32>
    %41 = arith.andi %39, %40 : vector<1x256xi32>
    %c4_i32 = arith.constant 4 : i32
    %42 = vector.broadcast %c4_i32 : i32 to vector<1x256xi32>
    %43 = arith.shrsi %39, %42 : vector<1x256xi32>
    %c15_i32_15 = arith.constant 15 : i32
    %44 = vector.broadcast %c15_i32_15 : i32 to vector<1x256xi32>
    %45 = arith.andi %43, %44 : vector<1x256xi32>
    %c0_i32 = arith.constant 0 : i32
    %46 = vector.broadcast %c0_i32 : i32 to vector<1x256xi32>
    %47 = arith.cmpi eq, %41, %46 : vector<1x256xi32>
    %c15_i32_16 = arith.constant 15 : i32
    %48 = vector.broadcast %c15_i32_16 : i32 to vector<1x256xi32>
    %49 = arith.cmpi eq, %41, %48 : vector<1x256xi32>
    %c0_i32_17 = arith.constant 0 : i32
    %50 = vector.broadcast %c0_i32_17 : i32 to vector<1x256xi32>
    %51 = arith.cmpi eq, %45, %50 : vector<1x256xi32>
    %c15_i32_18 = arith.constant 15 : i32
    %52 = vector.broadcast %c15_i32_18 : i32 to vector<1x256xi32>
    %53 = arith.cmpi eq, %45, %52 : vector<1x256xi32>
    %c255_i32 = arith.constant 255 : i32
    %54 = tpu.dynamic_rotate %38 by %c255_i32 dim 1 : vector<4x256xf32>, i32 -> vector<4x256xf32>
    %c1_i32 = arith.constant 1 : i32
    %55 = tpu.dynamic_rotate %38 by %c1_i32 dim 1 : vector<4x256xf32>, i32 -> vector<4x256xf32>
    %56 = vector.shape_cast %47 : vector<1x256xi1> to vector<1x256xi1>
    %57 = vector.broadcast %56 : vector<1x256xi1> to vector<4x256xi1>
    %58 = arith.select %57, %54, %55 : vector<4x256xi1>, vector<4x256xf32>
    %c1_i32_19 = arith.constant 1 : i32
    %59 = tpu.dynamic_rotate %38 by %c1_i32_19 dim 1 : vector<4x256xf32>, i32 -> vector<4x256xf32>
    %c255_i32_20 = arith.constant 255 : i32
    %60 = tpu.dynamic_rotate %38 by %c255_i32_20 dim 1 : vector<4x256xf32>, i32 -> vector<4x256xf32>
    %61 = vector.shape_cast %49 : vector<1x256xi1> to vector<1x256xi1>
    %62 = vector.broadcast %61 : vector<1x256xi1> to vector<4x256xi1>
    %63 = arith.select %62, %59, %60 : vector<4x256xi1>, vector<4x256xf32>
    %cst_21 = arith.constant 0.000000e+00 : f32
    %64 = vector.broadcast %cst_21 : f32 to vector<4x256xf32>
    %65 = tpu.concatenate %58, %64, %38, %64, %63, %64 in 0 : vector<4x256xf32>, vector<4x256xf32>, vector<4x256xf32>, vector<4x256xf32>, vector<4x256xf32>, vector<4x256xf32> -> vector<24x256xf32>
    %c240_i32 = arith.constant 240 : i32
    %66 = tpu.dynamic_rotate %65 by %c240_i32 dim 1 : vector<24x256xf32>, i32 -> vector<24x256xf32>
    %c16_i32 = arith.constant 16 : i32
    %67 = tpu.dynamic_rotate %65 by %c16_i32 dim 1 : vector<24x256xf32>, i32 -> vector<24x256xf32>
    %68 = vector.shape_cast %51 : vector<1x256xi1> to vector<1x256xi1>
    %69 = vector.broadcast %68 : vector<1x256xi1> to vector<24x256xi1>
    %70 = arith.select %69, %66, %67 : vector<24x256xi1>, vector<24x256xf32>
    %c16_i32_22 = arith.constant 16 : i32
    %71 = tpu.dynamic_rotate %65 by %c16_i32_22 dim 1 : vector<24x256xf32>, i32 -> vector<24x256xf32>
    %c240_i32_23 = arith.constant 240 : i32
    %72 = tpu.dynamic_rotate %65 by %c240_i32_23 dim 1 : vector<24x256xf32>, i32 -> vector<24x256xf32>
    %73 = vector.shape_cast %53 : vector<1x256xi1> to vector<1x256xi1>
    %74 = vector.broadcast %73 : vector<1x256xi1> to vector<24x256xi1>
    %75 = arith.select %74, %71, %72 : vector<24x256xi1>, vector<24x256xf32>
    %c0_24 = arith.constant 0 : index
    %c0_25 = arith.constant 0 : index
    %76 = vector.load %arg3[%c0_24, %c0_25] : memref<4x24xf32, #tpu.memory_space<vmem>>, vector<4x24xf32>
    %cst_26 = arith.constant dense<0.000000e+00> : vector<4x256xf32>
    %77 = tpu.matmul %76, %70, %cst_26 {dimension_numbers = #tpu.dot_dimension_numbers<[1], [0], [0], [1], [0, 0, 1, 1], [], []>} : vector<4x24xf32>, vector<24x256xf32>, vector<4x256xf32> -> vector<4x256xf32>
    %c0_27 = arith.constant 0 : index
    %c0_28 = arith.constant 0 : index
    %78 = vector.load %arg4[%c0_27, %c0_28] : memref<4x24xf32, #tpu.memory_space<vmem>>, vector<4x24xf32>
    %cst_29 = arith.constant dense<0.000000e+00> : vector<4x256xf32>
    %79 = tpu.matmul %78, %65, %cst_29 {dimension_numbers = #tpu.dot_dimension_numbers<[1], [0], [0], [1], [0, 0, 1, 1], [], []>} : vector<4x24xf32>, vector<24x256xf32>, vector<4x256xf32> -> vector<4x256xf32>
    %80 = arith.addf %77, %79 : vector<4x256xf32>
    %c0_30 = arith.constant 0 : index
    %c0_31 = arith.constant 0 : index
    %81 = vector.load %arg5[%c0_30, %c0_31] : memref<4x24xf32, #tpu.memory_space<vmem>>, vector<4x24xf32>
    %cst_32 = arith.constant dense<0.000000e+00> : vector<4x256xf32>
    %82 = tpu.matmul %81, %75, %cst_32 {dimension_numbers = #tpu.dot_dimension_numbers<[1], [0], [0], [1], [0, 0, 1, 1], [], []>} : vector<4x24xf32>, vector<24x256xf32>, vector<4x256xf32> -> vector<4x256xf32>
    %83 = arith.addf %80, %82 : vector<4x256xf32>
    %c0_33 = arith.constant 0 : index
    %c0_34 = arith.constant 0 : index
    %84 = vector.load %arg6[%c0_33, %c0_34] : memref<16x4xf32, #tpu.memory_space<vmem>>, vector<16x4xf32>
    %cst_35 = arith.constant dense<0.000000e+00> : vector<4xf32>
    %85 = vector.multi_reduction <add>, %83, %cst_35 [1] : vector<4x256xf32> to vector<4xf32>
    %86 = vector.shape_cast %85 : vector<4xf32> to vector<4x1xf32>
    %cst_36 = arith.constant 3.906250e-03 : f32
    %87 = vector.broadcast %cst_36 : f32 to vector<4x1xf32>
    %88 = arith.mulf %86, %87 : vector<4x1xf32>
    %89 = vector.broadcast %88 : vector<4x1xf32> to vector<4x256xf32>
    %90 = arith.subf %83, %89 : vector<4x256xf32>
    %91 = arith.mulf %90, %90 : vector<4x256xf32>
    %cst_37 = arith.constant dense<0.000000e+00> : vector<4xf32>
    %92 = vector.multi_reduction <add>, %91, %cst_37 [1] : vector<4x256xf32> to vector<4xf32>
    %93 = vector.shape_cast %92 : vector<4xf32> to vector<4x1xf32>
    %cst_38 = arith.constant 3.906250e-03 : f32
    %94 = vector.broadcast %cst_38 : f32 to vector<4x1xf32>
    %95 = arith.mulf %93, %94 : vector<4x1xf32>
    %cst_39 = arith.constant 9.99999974E-6 : f32
    %96 = vector.broadcast %cst_39 : f32 to vector<4x1xf32>
    %97 = arith.addf %95, %96 : vector<4x1xf32>
    %98 = math.rsqrt %97 : vector<4x1xf32>
    %99 = vector.broadcast %98 : vector<4x1xf32> to vector<4x256xf32>
    %100 = arith.mulf %90, %99 : vector<4x256xf32>
    %cst_40 = arith.constant 0.000000e+00 : f32
    %101 = vector.broadcast %cst_40 : f32 to vector<4x256xf32>
    %102 = arith.maximumf %100, %101 : vector<4x256xf32>
    %cst_41 = arith.constant dense<0.000000e+00> : vector<16x256xf32>
    %103 = tpu.matmul %84, %102, %cst_41 {dimension_numbers = #tpu.dot_dimension_numbers<[1], [0], [0], [1], [0, 0, 1, 1], [], []>} : vector<16x4xf32>, vector<4x256xf32>, vector<16x256xf32> -> vector<16x256xf32>
    %104 = arith.addf %0, %103 : vector<16x256xf32>
    %c0_42 = arith.constant 0 : index
    %c0_43 = arith.constant 0 : index
    %105 = vector.load %arg7[%c0_42, %c0_43] : memref<16x1xf32, #tpu.memory_space<vmem>>, vector<16x1xf32>
    %106 = vector.broadcast %105 : vector<16x1xf32> to vector<16x256xf32>
    %107 = arith.addf %104, %106 : vector<16x256xf32>
    %c0_44 = arith.constant 0 : index
    %c0_45 = arith.constant 0 : index
    %108 = vector.load %arg10[%c0_44, %c0_45] : memref<16x256xf32, #tpu.memory_space<vmem>>, vector<16x256xf32>
    tpu.vector_store %arg10[%c0_44, %c0_45], %107 {strides = array<i32>} : memref<16x256xf32, #tpu.memory_space<vmem>>, vector<16x256xf32>,
    return
  }
  func.func @transform_0(%arg0: i32) -> (i32, i32) {
    %c0_i32 = arith.constant 0 : i32
    %c0_i32_0 = arith.constant 0 : i32
    return %c0_i32, %arg0 : i32, i32
  }
  func.func @transform_1(%arg0: i32) -> (i32, i32) {
    %c0_i32 = arith.constant 0 : i32
    %c0_i32_0 = arith.constant 0 : i32
    %c0_i32_1 = arith.constant 0 : i32
    return %c0_i32, %c0_i32_0 : i32, i32
  }
  func.func @transform_2(%arg0: i32) -> (i32, i32) {
    %c0_i32 = arith.constant 0 : i32
    %c0_i32_0 = arith.constant 0 : i32
    %c0_i32_1 = arith.constant 0 : i32
    return %c0_i32, %c0_i32_0 : i32, i32
  }
  func.func @transform_3(%arg0: i32) -> (i32, i32) {
    %c0_i32 = arith.constant 0 : i32
    %c0_i32_0 = arith.constant 0 : i32
    %c0_i32_1 = arith.constant 0 : i32
    return %c0_i32, %c0_i32_0 : i32, i32
  }
  func.func @transform_4(%arg0: i32) -> (i32, i32) {
    %c0_i32 = arith.constant 0 : i32
    %c0_i32_0 = arith.constant 0 : i32
    %c0_i32_1 = arith.constant 0 : i32
    return %c0_i32, %c0_i32_0 : i32, i32
  }
  func.func @transform_5(%arg0: i32) -> (i32, i32) {
    %c0_i32 = arith.constant 0 : i32
    %c0_i32_0 = arith.constant 0 : i32
    %c0_i32_1 = arith.constant 0 : i32
    return %c0_i32, %c0_i32_0 : i32, i32
  }
  func.func @transform_6(%arg0: i32) -> (i32, i32) {
    %c0_i32 = arith.constant 0 : i32
    %c0_i32_0 = arith.constant 0 : i32
    %c0_i32_1 = arith.constant 0 : i32
    return %c0_i32, %c0_i32_0 : i32, i32
  }
  func.func @transform_7(%arg0: i32) -> (i32, i32) {
    %c0_i32 = arith.constant 0 : i32
    %c0_i32_0 = arith.constant 0 : i32
    %c0_i32_1 = arith.constant 0 : i32
    return %c0_i32, %c0_i32_0 : i32, i32
  }
  func.func @transform_8(%arg0: i32) -> (i32, i32) {
    %c0_i32 = arith.constant 0 : i32
    %c0_i32_0 = arith.constant 0 : i32
    %c0_i32_1 = arith.constant 0 : i32
    return %c0_i32, %c0_i32_0 : i32, i32
  }
  func.func @transform_9(%arg0: i32) -> (i32, i32) {
    %c0_i32 = arith.constant 0 : i32
    %c0_i32_0 = arith.constant 0 : i32
    return %c0_i32, %arg0 : i32, i32
  }
}

</mosaic_0001>

<bundles_post_ra>
// kernel: tpu_custom_call.1
= control target key start
LH: loop header
LB: loop body
LE: loop exit
PB: predicated region body
PF: predicated region fallthrough
CT: control target
= control target key end

     0   :  { %14 = vsyncpa [#allocation4], 0  ;;  %s1550_s0 = inlined_call_operand.vmem [shape: f32[16,512], index: 0, kind: input, shape index: {}]   ;;  %s1551_s1 = inlined_call_operand.vmem [shape: f32[4,16], index: 1, kind: input, shape index: {}]   ;;  %s1552_s2 = inlined_call_operand.vmem [shape: f32[4,24], index: 2, kind: input, shape index: {}]   ;;  %s1553_s3 = inlined_call_operand.vmem [shape: f32[4,24], index: 3, kind: input, shape index: {}]   ;;  %s1554_s4 = inlined_call_operand.vmem [shape: f32[4,24], index: 4, kind: input, shape index: {}]   ;;  %s1555_s5 = inlined_call_operand.vmem [shape: f32[16,4], index: 5, kind: input, shape index: {}]   ;;  %s1556_s6 = inlined_call_operand.vmem [shape: f32[16,1], index: 6, kind: input, shape index: {}]   ;;  %s1557_s7 = inlined_call_operand.vmem [shape: f32[256,1], index: 7, kind: input, shape index: {}]   ;;  %s1558_s8 = inlined_call_operand.vmem [shape: f32[1,256], index: 8, kind: input, shape index: {}]   ;;  %s1559_s9 = inlined_call_operand.hbm [shape: f32[16,512], index: 9, kind: output, shape index: {}]  }
   0x1   :  { %16 = vsyncpa [#allocation4 + $0x1], 0  ;;  %s1305_s30 = smov 0   ;;  %s1307_s10 = smov 0  }
   0x2   :  { %s1309_s11 = smov 0   ;;  %s1311_s12 = smov 0  }
   0x3 LB: > { %s1052_s7 = sadd.s32 4294967295, %s1244_s12   ;;  %s1053_s8 = sadd.s32 4294967294, %s1244_s12   ;;  %s1244_s12 = sphi %s1311_s12, %s1567_s12   ;;  %s1240_s11 = sphi %s1309_s11, %s1566_s11   ;;  %s1236_s10 = sphi %s1307_s10, %s1565_s10   ;;  %s1232_s30 = sphi %s1305_s30, %s1564_s30  }
   0x4   : > { %s1328_s13 = sadd.s32 1, %s1244_s12   ;;  %s29_s14 = sadd.s32 1, %s1240_s11 }
   0x5   : > { %s26_s15 = ssub.s32 %s1244_s12, %s1328_s13  ;;  %p36_p0 = scmp.ne.s32.totalorder %s1240_s11, %s1236_s10 }
   0x6   : > { %p27_p1 = scmp.eq.s32.totalorder %s26_s15, 0  ;;  %p37_p2 = scmp.eq.s32.totalorder %s1244_s12, 0 }
   0x7   : > { %p234_p3 = scmp.eq.s32.totalorder %s1052_s7, 1  ;;  %p239_p4 = scmp.ne.s32.totalorder %s1236_s10, %s1232_s30 }
   0x8   : > { %s1341_s16 = scalar_select %p27_p1, %s1240_s11, %s29_s14  }
   0x9   : > { %p38_p5 = por %p37_p2, %p36_p0  ;;  %p1343_p6 = por %p234_p3, %p36_p0 }
   0xa   : > { %p240_p7 = scmp.eq.s32.totalorder %s1053_s8, 1  ;;  %p1055_p9 = scmp.ge.s32.totalorder %s1244_s12, 2 }
   0xc   : > { %p1347_p8 = por %p240_p7, %p239_p4  ;;  %280 = sbr.rel (%p1055_p9) target bundleno = 26 (0x1a), region = 48 }
  0x13   : > { %283 = sbr.rel (!%p38_p5) target bundleno = 26 (0x1a), region = 52  ;;  %s285_s19 = sand.u32 (%p38_p5), 1, %s1240_s11  }
  0x14   : > { %s1081_s20 = sshll.u32 (%p38_p5), %s1244_s12, 4  ;;  %s1056_s21 = sshll.u32 (%p38_p5), %s285_s19, 5 }
  0x15   : > { %s290_s24 = scalar_lea.vmem (%p38_p5), %s1550_s0, %s1081_s20  ;;  %s287_s25 = scalar_lea.vmem (%p38_p5), [#allocation2], %s1056_s21 }
  0x16   : > { %v303_v0 = vld [vmem:[%s290_s24] sm:$0xff] (%p38_p5)  ;;  %v305_v1 = vld [vmem:[%s290_s24 + $0x8] sm:$0xff] (%p38_p5) }
  0x17   : > { %v307_v2 = vld [vmem:[%s290_s24 + $0x20] sm:$0xff] (%p38_p5)  ;;  %304 = vst [vmem:[%s287_s25] sm:$0xff] (%p38_p5), %v303_v0  ;;  %306 = vst [vmem:[%s287_s25 + $0x8] sm:$0xff] (%p38_p5), %v305_v1  ;;  %v309_v3 = vld [vmem:[%s290_s24 + $0x28] sm:$0xff] (%p38_p5) }
  0x18   : > { %308 = vst [vmem:[%s287_s25 + $0x10] sm:$0xff] (%p38_p5), %v307_v2  ;;  %310 = vst [vmem:[%s287_s25 + $0x18] sm:$0xff] (%p38_p5), %v309_v3 }
  0x1a PF: > { %p1059_p10 = scmp.ge.s32.totalorder %s1244_s12, 1  ;;  %p315_p11 = scmp.lt.s32.totalorder %s1244_s12, 3 }
  0x1c   : > { %p316_p12 = pnand %p1059_p10, %p315_p11 }
  0x1d   : > { %s322_s26 = sand.u32 (!%p316_p12), 1, %s1236_s10   ;;  %v1246_v24 = vmov (!%p316_p12), 0.0   ;;  %v363_v43 = vld [vmem:[%s1551_s1] sm:$0xf] (!%p316_p12)  ;;  %vm400_vm0 = vcmask (!%p316_p12), 130048   ;;  %vm475_vm1 = vcmask (!%p316_p12), 1043456   ;;  %v498_v2 = vlaneseq (!%p316_p12) }
  0x1e   : > { %319 = sbr.rel (%p316_p12) target bundleno = 1918 (0x77e), region = 75  ;;  %s1364_s27 = sshll.u32 (!%p316_p12), %s322_s26, 5  ;;  %468 = vmatprep.mubr.f32.mxu0 (!%p316_p12), %v1246_v24  ;;  %675 = vmatprep.mubr.f32.mxu1 (!%p316_p12), %v1246_v24  ;;  %vm1088_vm7 = vmpackc.low (!%p316_p12), %vm475_vm1, %vm475_vm1  ;;  %vm607_vm9 = vcmask (!%p316_p12), 195584  }
  0x1f   : > { %s324_s28 = scalar_lea.vmem (!%p316_p12), [#allocation2], %s1364_s27  ;;  %s1247_s14 = smov (!%p316_p12), 127   ;;  %v1393_v3 = vand.u32 (!%p316_p12), 127, %v498_v2 }
  0x20   : > { %v1367_v4 = vld [vmem:[%s324_s28] sm:$0xff] (!%p316_p12)  ;;  %v1369_v5 = vld [vmem:[%s324_s28 + $0x8] sm:$0xff] (!%p316_p12)  ;;  %v1371_v6 = vld [vmem:[%s324_s28 + $0x10] sm:$0xff] (!%p316_p12)  ;;  %s1248_s15 = smov (!%p316_p12), 1   ;;  %s1249_s19 = smov (!%p316_p12), 112  }
  0x21   : > { %v364_v7 = vadd.f32 (!%p316_p12), %v1369_v5, %v1367_v4  ;;  %v1375_v8 = vld [vmem:[%s324_s28 + $0x18] sm:$0xff] (!%p316_p12)  ;;  %vm519_vm2 = vcmp.lt.s32.totalorder (!%p316_p12), %v1393_v3, 127  ;;  %vm526_vm3 = vcmp.lt.s32.totalorder (!%p316_p12), %v1393_v3, 1  ;;  %s1250_s22 = smov (!%p316_p12), 16   ;;  %vm559_vm10 = vcmp.lt.s32.totalorder (!%p316_p12), %v1393_v3, 112  ;;  %s356_s24 = scalar_lea.vmem (!%p316_p12), [#allocation3], %s1364_s27 }
  0x22   : > { %v367_v9 = vadd.f32 (!%p316_p12), %v1375_v8, %v1371_v6  ;;  %vm578_vm11 = vcmp.lt.s32.totalorder (!%p316_p12), %v1393_v3, 16  ;;  %s985_s25 = sshll.u32 (!%p316_p12), %s356_s24, 4  ;;  %s1082_s28 = sshll.u32 (!%p316_p12), %s1052_s7, 8  ;;  %s1498_s25 = int_to_ptr.vmem [resolvable:$true] %s985_s25 }
  0x23   : > { %365 = vadd.xlane.f32.xlu0 (!%p316_p12), %v364_v7  ;;  %v500_v7 = vadd.s32 (!%p316_p12), 128, %v1393_v3  ;;  %s1503_s8 = scalar_lea.hbm (!%p316_p12), %s1559_s9, %s1082_s28  ;;  %s1182_s7 = scalar_lea.vmem (!%p316_p12), %s1498_s25, 512 }
  0x24   : > { %p1183_p13 = scmp.ne.s32.totalorder (!%p316_p12), %s1498_s25, %s1182_s7 }
  0x26   : > { %p1184_p0 = pnand %p1183_p13, %p1343_p6 }
  0x27   : > { %368 = vadd.xlane.f32.xlu0 %v367_v9 }
  0x28   : > { %p1185_p1 = pneg %p1184_p0 }
  0xb0   : > { %v366_v10 = vpop.xlane.xlu0 %365 }
  0xb1   : > { %v370_v11 = vmul.f32 0.00390625, %v366_v10  ;;  %v501_v10 = vand.u32 15, %v1393_v3 }
  0xb3   : > { %v372_v12 = vsub.f32 %v1367_v4, %v370_v11  ;;  %v373_v13 = vsub.f32 %v1369_v5, %v370_v11  ;;  %v502_v11 = vand.u32 15, %v500_v7  ;;  %vm507_vm4 = vcmp.eq.s32.totalorder %v501_v10, 0 }
  0xb4   : > { %v369_v14 = vpop.xlane.xlu0 %368  ;;  %vm509_vm8 = vcmp.eq.s32.totalorder %v501_v10, 15 }
  0xb5   : > { %v371_v15 = vmul.f32 0.00390625, %v369_v14  ;;  %v376_v16 = vmul.f32 %v372_v12, %v372_v12  ;;  %v377_v17 = vmul.f32 %v373_v13, %v373_v13  ;;  %vm508_vm5 = vcmp.eq.s32.totalorder %v502_v11, 0 }
  0xb6   : > { %vm1399_vm6 = vcmp.eq.s32.totalorder %v502_v11, 15 }
  0xb7   : > { %v374_v18 = vsub.f32 %v1371_v6, %v371_v15  ;;  %v375_v19 = vsub.f32 %v1375_v8, %v371_v15  ;;  %v380_v20 = vadd.f32 %v377_v17, %v376_v16 }
  0xb9   : > { %381 = vadd.xlane.f32.xlu1 %v380_v20  ;;  %v378_v21 = vmul.f32 %v374_v18, %v374_v18  ;;  %v379_v22 = vmul.f32 %v375_v19, %v375_v19 }
  0xbb   : > { %v383_v23 = vadd.f32 %v379_v22, %v378_v21 }
  0xbd   : > { %384 = vadd.xlane.f32.xlu1 %v383_v23 }
 0x146   : > { %v382_v25 = vpop.xlane.xlu1 %381 }
 0x147   : > { %v386_v26 = vmul.f32 0.00390625, %v382_v25 }
 0x149   : > { %v388_v27 = vadd.f32 1e-05, %v386_v26 }
 0x14a   : > { %v385_v28 = vpop.xlane.xlu1 %384 }
 0x14b   : > { %1174 = vrsqrt.f32 %v388_v27  ;;  %v387_v29 = vmul.f32 0.00390625, %v385_v28 }
 0x14d   : > { %v389_v30 = vadd.f32 1e-05, %v387_v29 }
 0x14f   : > { %1176 = vrsqrt.f32 %v389_v30 }
 0x155   : > { %v1175_v31 = vpop.eup %1174 }
 0x156   : > { %v393_v32 = vmul.f32 %v1175_v31, %v373_v13  ;;  %v392_v33 = vmul.f32 %v1175_v31, %v372_v12 }
 0x158   : > { %v397_v37 = vmax.f32 %v393_v32, 0.0  ;;  %v396_v39 = vmax.f32 %v392_v33, 0.0  ;;  %v606_v32 = vld [vmem:[%s1553_s3] sm:$0xf] }
 0x159   : > { %v1177_v34 = vpop.eup %1176 }
 0x15a   : > { %v395_v35 = vmul.f32 %v1177_v34, %v375_v19  ;;  %v394_v36 = vmul.f32 %v1177_v34, %v374_v18 }
 0x15c   : > { %v399_v38 = vmax.f32 %v395_v35, 0.0  ;;  %v398_v40 = vmax.f32 %v394_v36, 0.0  ;;  %v504_v36 = vshra.s32 %v500_v7, 4 }
 0x15e   : > { %v1083_v41 = vpack.c.bf16 %v399_v38, %v397_v37  ;;  %v1085_v42 = vpack.c.bf16 %v398_v40, %v396_v39  ;;  %v503_v37 = vshra.s32 %v1393_v3, 4  ;;  %v506_v40 = vand.u32 15, %v504_v36 }
 0x160   : > { %1084 = vmatprep.subr.bf16.mxu0 %v1083_v41  ;;  %v505_v41 = vand.u32 15, %v503_v37  ;;  %vm512_vm12 = vcmp.eq.s32.totalorder %v506_v40, 0  ;;  %vm514_vm14 = vcmp.eq.s32.totalorder %v506_v40, 15 }
 0x161   : > { %1086 = vmatpush1.bf16.msra.mxu0 %v1085_v42 }
 0x162   : > { %vm511_vm13 = vcmp.eq.s32.totalorder %v505_v41, 0  ;;  %vm513_vm15 = vcmp.eq.s32.totalorder %v505_v41, 15  ;;  %v951_v41 = vld [vmem:[%s1556_s6] sm:$0xff] }
 0x164   : > { %1062 = vmatmul.mubr.msk.f32.vlgmr.msra.gmra.mrb[0].mxu0 %vm400_vm0, %v363_v43  ;;  %vm857_vm0 = vcmask 31744  }
 0x165   : > { %934 = vmatprep.mubr.f32.mxu0 %v1246_v24 }
 0x237   : > { %v470_v44 = vpop.f32.mrb[0].mxu0 }
 0x238   : > { %v476_v45 = vsel %vm475_vm1, %v470_v44, 0.0  ;;  %v472_v46 = vpop.f32.mrb[1].mxu0 }
 0x239   : > { %v477_v47 = vsel %vm475_vm1, %v472_v46, 0.0 }
 0x23a   : > { %v478_v48 = vadd.f32 %v477_v47, %v476_v45 }
 0x23c   : > { %479 = vadd.xlane.f32.xlu0 %v478_v48 }
 0x2c9   : > { %v480_v49 = vpop.xlane.xlu0 %479 }
 0x2ca   : > { %v481_v50 = vmul.f32 0.00390625, %v480_v49 }
 0x2cc   : > { %v482_v51 = vsub.f32 %v470_v44, %v481_v50  ;;  %v483_v52 = vsub.f32 %v472_v46, %v481_v50 }
 0x2ce   : > { %v484_v53 = vmul.f32 %v482_v51, %v482_v51  ;;  %v485_v54 = vmul.f32 %v483_v52, %v483_v52 }
 0x2d0   : > { %v486_v55 = vsel %vm475_vm1, %v484_v53, 0.0  ;;  %v487_v56 = vsel %vm475_vm1, %v485_v54, 0.0 }
 0x2d1   : > { %v488_v57 = vadd.f32 %v487_v56, %v486_v55 }
 0x2d3   : > { %489 = vadd.xlane.f32.xlu1 %v488_v57 }
 0x360   : > { %v490_v58 = vpop.xlane.xlu1 %489 }
 0x361   : > { %v491_v59 = vmul.f32 0.00390625, %v490_v58 }
 0x363   : > { %v492_v60 = vadd.f32 1e-05, %v491_v59 }
 0x365   : > { %1178 = vrsqrt.f32 %v492_v60 }
 0x36f   : > { %v1179_v61 = vpop.eup %1178 }
 0x370   : > { %v495_v62 = vmul.f32 %v1179_v61, %v483_v52  ;;  %v494_v63 = vmul.f32 %v1179_v61, %v482_v51 }
 0x372   : > { %v497_v0 = vmax.f32 %v495_v62, 0.0  ;;  %v496_v1 = vmax.f32 %v494_v63, 0.0 }
 0x374   : > { %517 = vrot.lane.b32.xlu1 %v497_v0, %s1247_s14  ;;  %515 = vrot.lane.b32.xlu0 %v496_v1, %s1247_s14  ;;  %v544_v22 = vsel %vm475_vm1, %v497_v0, 0.0  ;;  %v543_v23 = vsel %vm475_vm1, %v496_v1, 0.0  ;;  %s1507_s14 = scalar_lea.sflag [#allocation4], %s322_s26 }
 0x378   : > { %522 = vrot.lane.b32.xlu1 %v496_v1, %s1248_s15 }
 0x37c   : > { %524 = vrot.lane.b32.xlu1 %v497_v0, %s1248_s15  ;;  %s1252_s15 = smov [#allocation3]  }
 0x3e6   : > { %v518_v9 = vpop.permute.xlu1 %517  ;;  %v516_v13 = vpop.permute.xlu0 %515 }
 0x3e7   : > { %v520_v16 = vsel %vm519_vm2, %v516_v13, %v518_v9  ;;  %v521_v17 = vsel %vm519_vm2, %v518_v9, %v516_v13 }
 0x3ea   : > { %v523_v12 = vpop.permute.xlu1 %522 }
 0x3ee   : > { %v525_v14 = vpop.permute.xlu1 %524 }
 0x3ef   : > { %v527_v18 = vsel %vm526_vm3, %v523_v12, %v525_v14  ;;  %v528_v19 = vsel %vm526_vm3, %v525_v14, %v523_v12 }
 0x3f0   : > { %v533_v20 = vsel %vm507_vm4, %v520_v16, %v528_v19  ;;  %v534_v21 = vsel %vm508_vm5, %v521_v17, %v527_v18  ;;  %v540_v31 = vsel %vm1399_vm6, %v527_v18, %v521_v17  ;;  %v539_v33 = vsel %vm509_vm8, %v528_v19, %v520_v16 }
 0x3f1   : > { %v542_v25 = vsel %vm475_vm1, %v534_v21, 0.0  ;;  %v1087_v26 = vpack.c.bf16 %v497_v0, %v534_v21  ;;  %v1090_v27 = vpack.c.bf16 %v496_v1, %v533_v20  ;;  %v541_v28 = vsel %vm475_vm1, %v533_v20, 0.0  ;;  %v605_v21 = vld [vmem:[%s1552_s2] sm:$0xf] }
 0x3f2   : > { %v1157_v29 = vpack.i.bf16 %v544_v22, %v542_v25  ;;  %v1152_v30 = vpack.i.bf16 %v543_v23, %v541_v28  ;;  %v546_v34 = vsel %vm475_vm1, %v540_v31, 0.0  ;;  %v545_v35 = vsel %vm475_vm1, %v539_v33, 0.0 }
 0x3f3   : > { %1089 = vmatprep.subr.msk.bf16.mxu1 %vm1088_vm7, %v1087_v26  ;;  %v756_v26 = vld [vmem:[%s1554_s4] sm:$0xf] }
 0x3f4   : > { %1158 = vrot.lane.b32.xlu1 %v1157_v29, %s1249_s19  ;;  %1092 = vmatpush1.bf16.msk.msra.mxu1 %vm1088_vm7, %v1090_v27 }
 0x3f5   : > { %1153 = vrot.lane.b32.xlu0 %v1152_v30, %s1249_s19  ;;  %1067 = vmatprep.subr.msk.mxu1 %vm475_vm1, %v540_v31 }
 0x3f8   : > { %1168 = vrot.lane.b32.xlu1 %v1157_v29, %s1250_s22  ;;  %1068 = vmatpush1.msk.msra.mxu1 %vm475_vm1, %v539_v33 }
 0x3f9   : > { %1163 = vrot.lane.b32.xlu0 %v1152_v30, %s1250_s22  ;;  %1069 = vmatmul.mubr.msk.f32.vlgmr.msra.gmra.mrb[0].mxu1 %vm607_vm9, %v606_v32 }
 0x3fa   : > { %749 = vmatprep.mubr.f32.mxu1 %v1246_v24 }
 0x3fc   : > { %557 = vrot.lane.b32.xlu1 %v546_v34, %s1249_s19 }
 0x3fd   : > { %551 = vrot.lane.b32.xlu0 %v545_v35, %s1249_s19  ;;  %s1186_s19 = sshll.u32 %s1252_s15, 4  ;;  %s1187_s19 = int_to_ptr.vmem [resolvable:$false] %s1186_s19 }
 0x3fe   : > { %s1188_s20 = scalar_lea.vmem %s1187_s19, 1024  ;;  %p1189_p2 = scmp.lt.s32.totalorder %s1498_s25, %s1187_s19 }
 0x3ff   : > { %p1190_p3 = scmp.lt.s32.totalorder %s1188_s20, %s1182_s7 }
 0x400   : > { %576 = vrot.lane.b32.xlu1 %v546_v34, %s1250_s22 }
 0x401   : > { %570 = vrot.lane.b32.xlu0 %v545_v35, %s1250_s22  ;;  %p1191_p4 = por %p1190_p3, %p1189_p2 }
 0x403   : > { %p1192_p5 = pnand %p1191_p4, %p1185_p1 }
 0x466   : > { %v1159_v38 = vpop.permute.xlu1 %1158 }
 0x467   : > { %v1154_v39 = vpop.permute.xlu0 %1153  ;;  %v1161_v42 = vunpack.i.h.bf16 %v1159_v38  ;;  %v1160_v43 = vunpack.i.l.bf16 %v1159_v38 }
 0x468   : > { %v1156_v44 = vunpack.i.h.bf16 %v1154_v39  ;;  %v1155_v45 = vunpack.i.l.bf16 %v1154_v39 }
 0x46a   : > { %v1169_v46 = vpop.permute.xlu1 %1168  ;;  %v561_v52 = vsel %vm559_vm10, %v1156_v44, %v1161_v42  ;;  %v564_v53 = vsel %vm559_vm10, %v1161_v42, %v1156_v44  ;;  %v560_v54 = vsel %vm559_vm10, %v1155_v45, %v1160_v43  ;;  %v563_v55 = vsel %vm559_vm10, %v1160_v43, %v1155_v45  ;;  %v952_v42 = vld [vmem:[%s1556_s6 + $0x8] sm:$0xff] }
 0x46b   : > { %v1171_v47 = vunpack.i.h.bf16 %v1169_v46  ;;  %v1170_v48 = vunpack.i.l.bf16 %v1169_v46  ;;  %v1164_v49 = vpop.permute.xlu0 %1163  ;;  %v1251_v43 = vmov 0  }
 0x46c   : > { %v1166_v50 = vunpack.i.h.bf16 %v1164_v49  ;;  %v1165_v51 = vunpack.i.l.bf16 %v1164_v49  ;;  %1172 = vset.pattern.permute.xlu0 %v1251_v43  ;;  %1173 = vset.pattern.permute.xlu1 %v1251_v43 }
 0x46e   : > { %v580_v56 = vsel %vm578_vm11, %v1166_v50, %v1171_v47  ;;  %v583_v57 = vsel %vm578_vm11, %v1171_v47, %v1166_v50  ;;  %v579_v58 = vsel %vm578_vm11, %v1165_v51, %v1170_v48  ;;  %v582_v59 = vsel %vm578_vm11, %v1170_v48, %v1165_v51  ;;  %v558_v60 = vpop.permute.xlu1 %557 }
 0x46f   : > { %v552_v61 = vpop.permute.xlu0 %551  ;;  %v590_v62 = vsel %vm512_vm12, %v563_v55, %v579_v58  ;;  %v592_v63 = vsel %vm512_vm12, %v564_v53, %v580_v56  ;;  %v589_v0 = vsel %vm511_vm13, %v560_v54, %v582_v59  ;;  %v591_v1 = vsel %vm511_vm13, %v561_v52, %v583_v57 }
 0x470   : > { %v1093_v2 = vpack.c.bf16 %v592_v63, %v590_v62  ;;  %v1095_v7 = vpack.c.bf16 %v591_v1, %v589_v0  ;;  %v562_v10 = vsel %vm559_vm10, %v552_v61, %v558_v60  ;;  %v565_v11 = vsel %vm559_vm10, %v558_v60, %v552_v61 }
 0x471   : > { %v600_v13 = vsel %vm514_vm14, %v579_v58, %v563_v55  ;;  %v602_v14 = vsel %vm514_vm14, %v580_v56, %v564_v53  ;;  %v599_v17 = vsel %vm513_vm15, %v582_v59, %v560_v54  ;;  %v601_v18 = vsel %vm513_vm15, %v583_v57, %v561_v52  ;;  %v833_v52 = vld [vmem:[%s1555_s5] sm:$0xff]  ;;  %v834_v53 = vld [vmem:[%s1555_s5 + $0x8] sm:$0xff] }
 0x472   : > { %1094 = vmatprep.subr.bf16.mxu1 %v1093_v2  ;;  %v577_v9 = vpop.permute.xlu1 %576  ;;  %v1097_v22 = vpack.c.bf16 %v602_v14, %v600_v13  ;;  %v1099_v23 = vpack.c.bf16 %v601_v18, %v599_v17 }
 0x473   : > { %v571_v12 = vpop.permute.xlu0 %570  ;;  %1096 = vmatpush1.bf16.msra.mxu1 %v1095_v7 }
 0x474   : > { %v581_v15 = vsel %vm578_vm11, %v571_v12, %v577_v9  ;;  %v584_v16 = vsel %vm578_vm11, %v577_v9, %v571_v12 }
 0x475   : > { %v594_v19 = vsel %vm512_vm12, %v565_v11, %v581_v15  ;;  %v593_v20 = vsel %vm511_vm13, %v562_v10, %v584_v16  ;;  %v604_v3 = vsel %vm514_vm14, %v581_v15, %v565_v11  ;;  %v603_v25 = vsel %vm513_vm15, %v584_v16, %v562_v10 }
 0x476   : > { %689 = vmatprep.subr.mxu1 %v594_v19 }
 0x477   : > { %690 = vmatpush1.msra.mxu1 %v593_v20 }
 0x478   : > { %1070 = vmatmul.mubr.msk.f32.vlgmr.msra.gmra.mrb[0].mxu1 %vm607_vm9, %v605_v21  ;;  %1098 = vmatprep.subr.bf16.mxu1 %v1097_v22 }
 0x479   : > { %1100 = vmatpush1.bf16.msra.mxu1 %v1099_v23  ;;  %824 = vmatprep.mubr.f32.mxu1 %v1246_v24 }
 0x47a   : > { %764 = vmatprep.subr.mxu1 %v604_v3 }
 0x47d   : > { %765 = vmatpush1.msra.mxu1 %v603_v25 }
 0x480   : > { %1071 = vmatmul.mubr.msk.f32.vlgmr.msra.gmra.mrb[0].mxu1 %vm607_vm9, %v756_v26 }
 0x553   : > { %v826_v27 = vpop.f32.mrb[0].mxu1 }
 0x554   : > { %v835_v28 = vsel %vm475_vm1, %v826_v27, 0.0  ;;  %v828_v29 = vpop.f32.mrb[1].mxu1 }
 0x555   : > { %v836_v30 = vsel %vm475_vm1, %v828_v29, 0.0 }
 0x556   : > { %v837_v31 = vadd.f32 %v836_v30, %v835_v28 }
 0x558   : > { %838 = vadd.xlane.f32.xlu0 %v837_v31 }
 0x56e   : > { %955 = vperm.xlu0 %1172, %v951_v41  }
 0x5e5   : > { %v839_v32 = vpop.xlane.xlu0 %838 }
 0x5e6   : > { %v840_v33 = vmul.f32 0.00390625, %v839_v32 }
 0x5e8   : > { %v841_v34 = vsub.f32 %v826_v27, %v840_v33  ;;  %v842_v35 = vsub.f32 %v828_v29, %v840_v33 }
 0x5ea   : > { %v843_v36 = vmul.f32 %v841_v34, %v841_v34  ;;  %v844_v37 = vmul.f32 %v842_v35, %v842_v35 }
 0x5ec   : > { %v845_v38 = vsel %vm475_vm1, %v843_v36, 0.0  ;;  %v846_v39 = vsel %vm475_vm1, %v844_v37, 0.0 }
 0x5ed   : > { %v847_v40 = vadd.f32 %v846_v39, %v845_v38  ;;  %v956_v55 = vpop.permute.xlu0 %955 }
 0x5ef   : > { %848 = vadd.xlane.f32.xlu1 %v847_v40 }
 0x600   : > { %960 = vperm.xlu1 %1173, %v952_v42  }
 0x67c   : > { %v849_v44 = vpop.xlane.xlu1 %848 }
 0x67d   : > { %v850_v45 = vmul.f32 0.00390625, %v849_v44 }
 0x67f   : > { %v851_v46 = vadd.f32 1e-05, %v850_v45 }
 0x681   : > { %1180 = vrsqrt.f32 %v851_v46 }
 0x68b   : > { %v1181_v47 = vpop.eup %1180 }
 0x68c   : > { %v854_v48 = vmul.f32 %v1181_v47, %v842_v35  ;;  %v853_v49 = vmul.f32 %v1181_v47, %v841_v34 }
 0x68e   : > { %v856_v50 = vmax.f32 %v854_v48, 0.0  ;;  %v855_v51 = vmax.f32 %v853_v49, 0.0 }
 0x690   : > { %1072 = vmatprep.subr.msk.mxu0 %vm475_vm1, %v856_v50 }
 0x691   : > { %1073 = vmatpush1.msk.msra.mxu0 %vm475_vm1, %v855_v51 }
 0x692   : > { %1074 = vmatmul.mubr.msk.f32.vlgmr.msra.gmra.mrb[2].mxu0 %vm857_vm0, %v833_v52 }
 0x693   : > { %940 = vmatprep.mubr.f32.mxu0 %v1246_v24  ;;  %v961_v24 = vpop.permute.xlu1 %960 }
 0x696   : > { %1075 = vmatmul.mubr.msk.f32.gmra.mrb[4].mxu0 %vm857_vm0, %v834_v53 }
 0x765   : > { %v936_v54 = vpop.f32.mrb[2].mxu0 }
 0x766   : > { %v947_v56 = vadd.f32 %v936_v54, %v1367_v4  ;;  %v938_v57 = vpop.f32.mrb[3].mxu0 }
 0x767   : > { %v948_v58 = vadd.f32 %v938_v57, %v1369_v5 }
 0x768   : > { %v963_v59 = vadd.f32 %v956_v55, %v947_v56 }
 0x769   : > { %v964_v60 = vadd.f32 %v956_v55, %v948_v58  ;;  %v942_v61 = vpop.f32.mrb[4].mxu0 }
 0x76a   : > { %967 = vst [vmem:[%s356_s24] sm:$0xff] %v963_v59  ;;  %v949_v62 = vadd.f32 %v942_v61, %v1371_v6  ;;  %v944_v63 = vpop.f32.mrb[5].mxu0 }
 0x76b   : > { %968 = vst [vmem:[%s356_s24 + $0x8] sm:$0xff] %v964_v60  ;;  %v950_v4 = vadd.f32 %v944_v63, %v1375_v8 }
 0x76c   : > { %v965_v5 = vadd.f32 %v961_v24, %v949_v62 }
 0x76d   : > { %v966_v0 = vadd.f32 %v961_v24, %v950_v4 }
 0x76e   : > { %969 = vst [vmem:[%s356_s24 + $0x10] sm:$0xff] %v965_v5 }
 0x76f   : > { %970 = vst [vmem:[%s356_s24 + $0x18] sm:$0xff] %v966_v0 }
 0x770   : > { %1195 = shalt.err (!%p1192_p5)
}
 0x771   : > { %s1196_s26 = scalar_lea.hbm %s1503_s8, 512  ;;  %s1200_s24 = scalar_lea.hbm %s1559_s9, 1024 }
 0x772   : > { %p1197_p7 = scmp.ne.s32.totalorder %s1503_s8, %s1196_s26  ;;  %p1201_p12 = scmp.lt.u32.totalorder %s1503_s8, %s1559_s9 }
 0x773   : > { %p1202_p13 = scmp.lt.u32.totalorder %s1200_s24, %s1196_s26  ;;  %p1204_p1 = scmp.lt.u32.totalorder %s1196_s26, %s1503_s8 }
 0x774   : > { %p1198_p10 = pnand %p1197_p7, %p1343_p6 }
 0x775   : > { %p1203_p0 = por %p1202_p13, %p1201_p12 }
 0x776   : > { %p1199_p11 = pneg %p1198_p10 }
 0x777   : > { %p1205_p2 = por %p1204_p1, %p1203_p0 }
 0x779   : > { %p1206_p3 = pnand %p1205_p2, %p1199_p11 }
 0x77b   : > { %1209 = shalt.err (!%p1206_p3)
}
 0x77c   : > { %s1253_s29 = smov 256   ;;  %s1254_s7 = smov 512  }
 0x77d   : > { %1105 = dma.vmem_to_hbm [thread:$0]  (%p1343_p6), %s1498_s25, 512, %s1503_s8, %s1507_s14, %s1253_s29, %s1254_s7, %s1250_s22  }
 0x77e PF: > { %s1000_s15 = sand.u32 1, %s1232_s30   ;;  %p1108_p4 = pnand %p1055_p9, %p1347_p8 }
 0x77f   : > { %s1001_s19 = scalar_lea.sflag [#allocation4], %s1000_s15 }
 0x780   : > { %1227 = dma.done.wait (!%p1108_p4), %s1001_s19, 512  }
 0x781   : > { %1229 = vsyncadd (!%p1108_p4), %s1001_s19, 4294966784  ;;  %p19_p5 = scmp.ge.s32.totalorder %s1328_s13, 4   ;;  %s1564_s30 = smov %s1236_s10 }
 0x782   : > { %s1565_s10 = smov %s1240_s11  ;;  %s1566_s11 = smov %s1341_s16 }
 0x783   : > { %s1567_s12 = smov %s1328_s13  ;;  %21 = sbr.rel (!%p19_p5) target bundleno = 3 (0x3), region = 119 }
 0x78a   :  { %1006 = vsyncpa [#allocation4], 1 }
 0x78b   :  { %1008 = vsyncpa [#allocation4 + $0x1], 1 }

</bundles_post_ra>
